<compile_context>
chip_gen: v6e
topology: v6e:2x2x1
jax: 0.10.0
libtpu: 0.0.40
codegen_flags: <defaults>
</compile_context>

<pallas_src>
import functools

import jax
import jax.numpy as jnp
from jax import lax
from jax.experimental import pallas as pl
from jax.experimental.pallas import tpu as pltpu

_EPS = 1e-12           # F.normalize default eps
_EPS_SQ = _EPS * _EPS


def _infonce_kernel(anchor_ref, sample_ref, pos_ref, neg_ref, out_ref,
                    a_n_sc, gmax_sc, den_sc, num_sc, psum_sc, *, tau):
    j = pl.program_id(0)

    @pl.when(j == 0)
    def _init():
        a = anchor_ref[...].astype(jnp.float32)                        # [N, D]
        inv_norm = lax.rsqrt(
            jnp.maximum(jnp.sum(a * a, axis=1, keepdims=True), _EPS_SQ))
        # Fold 1/tau into the normalized anchor (per-row scaling, not O(N*M)).
        a_n_sc[...] = a * (inv_norm * (1.0 / tau))
        gmax_sc[...] = jnp.full_like(gmax_sc, -jnp.inf)
        den_sc[...] = jnp.zeros_like(den_sc)
        num_sc[...] = jnp.zeros_like(num_sc)
        psum_sc[...] = jnp.zeros_like(psum_sc)

    s = sample_ref[...].astype(jnp.float32)                            # [tm, D]
    pos = pos_ref[...].astype(jnp.float32)                             # [N, tm]
    neg = neg_ref[...].astype(jnp.float32)                             # [N, tm]

    inv_norm_s = lax.rsqrt(
        jnp.maximum(jnp.sum(s * s, axis=1, keepdims=True), _EPS_SQ))
    s_n = s * inv_norm_s                                               # [tm, D]

    # Cosine similarities for this M tile, already scaled by 1/tau: [N, tm].
    sim = lax.dot_general(
        a_n_sc[...], s_n,
        dimension_numbers=(((1,), (1,)), ((), ())),
        preferred_element_type=jnp.float32)

    # torch.max(sim, dim=0): column max. A no-op when N == 1, so apply always.
    sim_row = jnp.max(sim, axis=0, keepdims=True)                      # [1, tm]

    # Online running max -> numerically safe exp (the shift cancels exactly).
    m_old = gmax_sc[...]                                               # [1, 1]
    m_new = jnp.maximum(m_old, jnp.max(sim_row, axis=1, keepdims=True))
    e = jnp.exp(sim_row - m_new)                                       # [1, tm]
    rescale = jnp.exp(m_old - m_new)                                   # [1, 1]

    # The whole [N, tm] elementwise block collapses into two MXU mat-vecs.
    den_part = lax.dot_general(
        pos + neg, e, dimension_numbers=(((1,), (1,)), ((), ())),
        preferred_element_type=jnp.float32)                            # [N, 1]
    num_part = lax.dot_general(
        pos, sim_row, dimension_numbers=(((1,), (1,)), ((), ())),
        preferred_element_type=jnp.float32)                            # [N, 1]
    psum_part = jnp.sum(pos, axis=1, keepdims=True)                    # [N, 1]

    den_sc[...] = den_sc[...] * rescale + den_part
    num_sc[...] = num_sc[...] + num_part
    psum_sc[...] = psum_sc[...] + psum_part
    gmax_sc[...] = m_new

    @pl.when(j == pl.num_programs(0) - 1)
    def _finalize():
        log_den = jnp.log(den_sc[...]) + gmax_sc[...]                  # [N, 1]
        loss = num_sc[...] / psum_sc[...] - log_den                    # [N, 1]
        out_ref[...] = jnp.broadcast_to(-jnp.mean(loss), (1, 1))


def infonce_pallas(anchor, sample, pos_mask, neg_mask, tau, *, tile_m=512):
    """InfoNCE loss; streams sample/masks over an M-tiled reduction grid."""
    N, D = anchor.shape
    M, _ = sample.shape

    # Tile over M only when it divides evenly (use lane-aligned multiples of
    # 128); otherwise fall back to a single resident tile for small problems.
    tm = tile_m if (M % tile_m == 0 and M > tile_m) else M
    grid = (M // tm,)

    kernel = functools.partial(_infonce_kernel, tau=float(tau))
    out = pl.pallas_call(
        kernel,
        out_shape=jax.ShapeDtypeStruct((1, 1), jnp.float32),
        grid_spec=pltpu.PrefetchScalarGridSpec(
            num_scalar_prefetch=0,
            grid=grid,
            in_specs=[
                pl.BlockSpec((N, D), lambda j: (0, 0)),    # anchor (resident)
                pl.BlockSpec((tm, D), lambda j: (j, 0)),   # sample tile
                pl.BlockSpec((N, tm), lambda j: (0, j)),   # pos_mask tile
                pl.BlockSpec((N, tm), lambda j: (0, j)),   # neg_mask tile
            ],
            out_specs=pl.BlockSpec((1, 1), lambda j: (0, 0)),
            scratch_shapes=[
                pltpu.VMEM((N, D), jnp.float32),   # normalized, tau-scaled anchor
                pltpu.VMEM((1, 1), jnp.float32),   # running column max
                pltpu.VMEM((N, 1), jnp.float32),   # running denominator
                pltpu.VMEM((N, 1), jnp.float32),   # running numerator
                pltpu.VMEM((N, 1), jnp.float32),   # running pos row-sum
            ],
        ),
        compiler_params=pltpu.CompilerParams(
            dimension_semantics=("arbitrary",),       # M is a reduction axis
            vmem_limit_bytes=32 * 1024 * 1024,        # safe on v5e/v6e/v7x
        ),
    )(anchor, sample, pos_mask, neg_mask)
    return out[0, 0]


def infonce_ref(anchor, sample, pos_mask, neg_mask, tau):
    """Pure-JAX reference mirroring the PyTorch code."""
    a = anchor / jnp.maximum(
        jnp.linalg.norm(anchor, axis=1, keepdims=True), _EPS)
    s = sample / jnp.maximum(
        jnp.linalg.norm(sample, axis=1, keepdims=True), _EPS)
    sim = (a @ s.T) / tau
    if anchor.shape[0] > 1:
        sim = jnp.max(sim, axis=0, keepdims=True)
    exp_sim = jnp.exp(sim) * (pos_mask + neg_mask)
    log_prob = sim - jnp.log(jnp.sum(exp_sim, axis=1, keepdims=True))
    loss = jnp.sum(log_prob * pos_mask, axis=1) / jnp.sum(pos_mask, axis=1)
    return -jnp.mean(loss)


if __name__ == "__main__":
    # Module __init__ has only a scalar hyperparameter tau (no weights).
    tau = 0.5

    # --- Test 1: tiny shapes (single tile, matches the module's toy usage) ---
    N, M, D = 8, 8, 32
    key = jax.random.PRNGKey(0)
    k1, k2, k3, k4 = jax.random.split(key, 4)
    anchor = jax.random.normal(k1, (N, D), dtype=jnp.float32)
    sample = jax.random.normal(k2, (M, D), dtype=jnp.float32)
    pos_mask = jnp.eye(N, M, dtype=jnp.float32)          # one positive per row
    neg_mask = 1.0 - pos_mask

    loss = infonce_pallas(anchor, sample, pos_mask, neg_mask, tau)
    jax.block_until_ready(loss)
    ref = infonce_ref(anchor, sample, pos_mask, neg_mask, tau)
    assert jnp.allclose(loss, ref, rtol=1e-5, atol=1e-5), (loss, ref)

    # --- Test 2: exercise the M-tiled grid path (2 tiles of 128 columns) ---
    N2, M2, D2 = 8, 256, 128
    anchor2 = jax.random.normal(k3, (N2, D2), dtype=jnp.float32)
    sample2 = jax.random.normal(k4, (M2, D2), dtype=jnp.float32)
    pos2 = (jnp.arange(M2)[None, :] % N2 == jnp.arange(N2)[:, None])
    pos2 = pos2.astype(jnp.float32)
    neg2 = 1.0 - pos2

    loss2 = infonce_pallas(anchor2, sample2, pos2, neg2, tau, tile_m=128)
    jax.block_until_ready(loss2)
    ref2 = infonce_ref(anchor2, sample2, pos2, neg2, tau)
    assert jnp.allclose(loss2, ref2, rtol=1e-5, atol=1e-5), (loss2, ref2)

    print("KERNEL_OK")
</pallas_src>

<mosaic_0001>
module attributes {stable_mosaic.version = 11 : i64} {
  func.func @_infonce_kernel(%arg0: i32, %arg1: memref<8x32xf32, #tpu.memory_space<vmem>>, %arg2: memref<8x32xf32, #tpu.memory_space<vmem>>, %arg3: memref<8x8xf32, #tpu.memory_space<vmem>>, %arg4: memref<8x8xf32, #tpu.memory_space<vmem>>, %arg5: memref<1x1xf32, #tpu.memory_space<vmem>>, %arg6: memref<8x32xf32, #tpu.memory_space<vmem>>, %arg7: memref<1x1xf32, #tpu.memory_space<vmem>>, %arg8: memref<8x1xf32, #tpu.memory_space<vmem>>, %arg9: memref<8x1xf32, #tpu.memory_space<vmem>>, %arg10: memref<8x1xf32, #tpu.memory_space<vmem>>) attributes {dimension_semantics = [#tpu.dimension_semantics<arbitrary>], iteration_bounds = array<i64: 1>, scalar_prefetch = 0 : i64, scratch_operands = 5 : i64, tpu.core_type = #tpu.core_type<tc>, window_params = [{pipeline_mode = #tpu.pipeline_mode<synchronous>, transform_indices = @transform_0, window_bounds = array<i64: 8, 32>}, {transform_indices = @transform_1, window_bounds = array<i64: 8, 32>}, {transform_indices = @transform_2, window_bounds = array<i64: 8, 8>}, {transform_indices = @transform_3, window_bounds = array<i64: 8, 8>}, {pipeline_mode = #tpu.pipeline_mode<synchronous>, transform_indices = @transform_4, window_bounds = array<i64: 1, 1>}]} {
    %c0_i32 = arith.constant 0 : i32
    %0 = arith.cmpi eq, %arg0, %c0_i32 : i32
    %1 = arith.extui %0 : i1 to i32
    %c0_i32_0 = arith.constant 0 : i32
    %2 = arith.cmpi ne, %1, %c0_i32_0 : i32
    scf.if %2 {
      %c0_33 = arith.constant 0 : index
      %c0_34 = arith.constant 0 : index
      %47 = vector.load %arg1[%c0_33, %c0_34] : memref<8x32xf32, #tpu.memory_space<vmem>>, vector<8x32xf32>
      %48 = arith.mulf %47, %47 : vector<8x32xf32>
      %cst_35 = arith.constant dense<0.000000e+00> : vector<8xf32>
      %49 = vector.multi_reduction <add>, %48, %cst_35 [1] : vector<8x32xf32> to vector<8xf32>
      %50 = vector.shape_cast %49 : vector<8xf32> to vector<8x1xf32>
      %cst_36 = arith.constant 1.000000e-24 : f32
      %51 = vector.broadcast %cst_36 : f32 to vector<8x1xf32>
      %52 = arith.maximumf %50, %51 : vector<8x1xf32>
      %53 = math.rsqrt %52 : vector<8x1xf32>
      %cst_37 = arith.constant 2.000000e+00 : f32
      %54 = vector.broadcast %cst_37 : f32 to vector<8x1xf32>
      %55 = arith.mulf %53, %54 : vector<8x1xf32>
      %56 = vector.broadcast %55 : vector<8x1xf32> to vector<8x32xf32>
      %57 = arith.mulf %47, %56 : vector<8x32xf32>
      %c0_38 = arith.constant 0 : index
      %c0_39 = arith.constant 0 : index
      %58 = vector.load %arg6[%c0_38, %c0_39] : memref<8x32xf32, #tpu.memory_space<vmem>>, vector<8x32xf32>
      tpu.vector_store %arg6[%c0_38, %c0_39], %57 {strides = array<i32>} : memref<8x32xf32, #tpu.memory_space<vmem>>, vector<8x32xf32>,
      %cst_40 = arith.constant 0xFF800000 : f32
      %59 = vector.broadcast %cst_40 : f32 to vector<1x1xf32>
      %c0_41 = arith.constant 0 : index
      %c0_42 = arith.constant 0 : index
      %60 = vector.load %arg7[%c0_41, %c0_42] : memref<1x1xf32, #tpu.memory_space<vmem>>, vector<1x1xf32>
      tpu.vector_store %arg7[%c0_41, %c0_42], %59 {strides = array<i32>} : memref<1x1xf32, #tpu.memory_space<vmem>>, vector<1x1xf32>,
      %cst_43 = arith.constant 0.000000e+00 : f32
      %61 = vector.broadcast %cst_43 : f32 to vector<8x1xf32>
      %c0_44 = arith.constant 0 : index
      %c0_45 = arith.constant 0 : index
      %62 = vector.load %arg8[%c0_44, %c0_45] : memref<8x1xf32, #tpu.memory_space<vmem>>, vector<8x1xf32>
      tpu.vector_store %arg8[%c0_44, %c0_45], %61 {strides = array<i32>} : memref<8x1xf32, #tpu.memory_space<vmem>>, vector<8x1xf32>,
      %cst_46 = arith.constant 0.000000e+00 : f32
      %63 = vector.broadcast %cst_46 : f32 to vector<8x1xf32>
      %c0_47 = arith.constant 0 : index
      %c0_48 = arith.constant 0 : index
      %64 = vector.load %arg9[%c0_47, %c0_48] : memref<8x1xf32, #tpu.memory_space<vmem>>, vector<8x1xf32>
      tpu.vector_store %arg9[%c0_47, %c0_48], %63 {strides = array<i32>} : memref<8x1xf32, #tpu.memory_space<vmem>>, vector<8x1xf32>,
      %cst_49 = arith.constant 0.000000e+00 : f32
      %65 = vector.broadcast %cst_49 : f32 to vector<8x1xf32>
      %c0_50 = arith.constant 0 : index
      %c0_51 = arith.constant 0 : index
      %66 = vector.load %arg10[%c0_50, %c0_51] : memref<8x1xf32, #tpu.memory_space<vmem>>, vector<8x1xf32>
      tpu.vector_store %arg10[%c0_50, %c0_51], %65 {strides = array<i32>} : memref<8x1xf32, #tpu.memory_space<vmem>>, vector<8x1xf32>,
    } else {
    }
    %c0 = arith.constant 0 : index
    %c0_1 = arith.constant 0 : index
    %3 = vector.load %arg2[%c0, %c0_1] : memref<8x32xf32, #tpu.memory_space<vmem>>, vector<8x32xf32>
    %c0_2 = arith.constant 0 : index
    %c0_3 = arith.constant 0 : index
    %4 = vector.load %arg3[%c0_2, %c0_3] : memref<8x8xf32, #tpu.memory_space<vmem>>, vector<8x8xf32>
    %c0_4 = arith.constant 0 : index
    %c0_5 = arith.constant 0 : index
    %5 = vector.load %arg4[%c0_4, %c0_5] : memref<8x8xf32, #tpu.memory_space<vmem>>, vector<8x8xf32>
    %6 = arith.mulf %3, %3 : vector<8x32xf32>
    %cst = arith.constant dense<0.000000e+00> : vector<8xf32>
    %7 = vector.multi_reduction <add>, %6, %cst [1] : vector<8x32xf32> to vector<8xf32>
    %8 = vector.shape_cast %7 : vector<8xf32> to vector<8x1xf32>
    %cst_6 = arith.constant 1.000000e-24 : f32
    %9 = vector.broadcast %cst_6 : f32 to vector<8x1xf32>
    %10 = arith.maximumf %8, %9 : vector<8x1xf32>
    %11 = math.rsqrt %10 : vector<8x1xf32>
    %12 = vector.broadcast %11 : vector<8x1xf32> to vector<8x32xf32>
    %13 = arith.mulf %3, %12 : vector<8x32xf32>
    %c0_7 = arith.constant 0 : index
    %c0_8 = arith.constant 0 : index
    %14 = vector.load %arg6[%c0_7, %c0_8] : memref<8x32xf32, #tpu.memory_space<vmem>>, vector<8x32xf32>
    %cst_9 = arith.constant dense<0.000000e+00> : vector<8x8xf32>
    %15 = tpu.matmul %14, %13, %cst_9 {dimension_numbers = #tpu.dot_dimension_numbers<[1], [1], [0], [0], [0, 0, 1, 0], [], []>} : vector<8x32xf32>, vector<8x32xf32>, vector<8x8xf32> -> vector<8x8xf32>
    %cst_10 = arith.constant dense<0xFF800000> : vector<8xf32>
    %16 = vector.multi_reduction <maximumf>, %15, %cst_10 [0] : vector<8x8xf32> to vector<8xf32>
    %17 = vector.shape_cast %16 : vector<8xf32> to vector<1x8xf32>
    %c0_11 = arith.constant 0 : index
    %c0_12 = arith.constant 0 : index
    %18 = vector.load %arg7[%c0_11, %c0_12] : memref<1x1xf32, #tpu.memory_space<vmem>>, vector<1x1xf32>
    %cst_13 = arith.constant dense<0xFF800000> : vector<1xf32>
    %19 = vector.multi_reduction <maximumf>, %17, %cst_13 [1] : vector<1x8xf32> to vector<1xf32>
    %20 = vector.shape_cast %19 : vector<1xf32> to vector<1x1xf32>
    %21 = arith.maximumf %18, %20 : vector<1x1xf32>
    %22 = vector.broadcast %21 : vector<1x1xf32> to vector<1x8xf32>
    %23 = arith.subf %17, %22 : vector<1x8xf32>
    %24 = math.exp %23 : vector<1x8xf32>
    %25 = arith.subf %18, %21 : vector<1x1xf32>
    %26 = math.exp %25 : vector<1x1xf32>
    %27 = arith.addf %4, %5 : vector<8x8xf32>
    %cst_14 = arith.constant dense<0.000000e+00> : vector<8x1xf32>
    %28 = tpu.matmul %27, %24, %cst_14 {dimension_numbers = #tpu.dot_dimension_numbers<[1], [1], [0], [0], [0, 0, 1, 0], [], []>} : vector<8x8xf32>, vector<1x8xf32>, vector<8x1xf32> -> vector<8x1xf32>
    %cst_15 = arith.constant dense<0.000000e+00> : vector<8x1xf32>
    %29 = tpu.matmul %4, %17, %cst_15 {dimension_numbers = #tpu.dot_dimension_numbers<[1], [1], [0], [0], [0, 0, 1, 0], [], []>} : vector<8x8xf32>, vector<1x8xf32>, vector<8x1xf32> -> vector<8x1xf32>
    %cst_16 = arith.constant dense<0.000000e+00> : vector<8xf32>
    %30 = vector.multi_reduction <add>, %4, %cst_16 [1] : vector<8x8xf32> to vector<8xf32>
    %31 = vector.shape_cast %30 : vector<8xf32> to vector<8x1xf32>
    %c0_17 = arith.constant 0 : index
    %c0_18 = arith.constant 0 : index
    %32 = vector.load %arg8[%c0_17, %c0_18] : memref<8x1xf32, #tpu.memory_space<vmem>>, vector<8x1xf32>
    %33 = vector.broadcast %26 : vector<1x1xf32> to vector<8x1xf32>
    %34 = arith.mulf %32, %33 : vector<8x1xf32>
    %35 = arith.addf %34, %28 : vector<8x1xf32>
    %c0_19 = arith.constant 0 : index
    %c0_20 = arith.constant 0 : index
    %36 = vector.load %arg8[%c0_19, %c0_20] : memref<8x1xf32, #tpu.memory_space<vmem>>, vector<8x1xf32>
    tpu.vector_store %arg8[%c0_19, %c0_20], %35 {strides = array<i32>} : memref<8x1xf32, #tpu.memory_space<vmem>>, vector<8x1xf32>,
    %c0_21 = arith.constant 0 : index
    %c0_22 = arith.constant 0 : index
    %37 = vector.load %arg9[%c0_21, %c0_22] : memref<8x1xf32, #tpu.memory_space<vmem>>, vector<8x1xf32>
    %38 = arith.addf %37, %29 : vector<8x1xf32>
    %c0_23 = arith.constant 0 : index
    %c0_24 = arith.constant 0 : index
    %39 = vector.load %arg9[%c0_23, %c0_24] : memref<8x1xf32, #tpu.memory_space<vmem>>, vector<8x1xf32>
    tpu.vector_store %arg9[%c0_23, %c0_24], %38 {strides = array<i32>} : memref<8x1xf32, #tpu.memory_space<vmem>>, vector<8x1xf32>,
    %c0_25 = arith.constant 0 : index
    %c0_26 = arith.constant 0 : index
    %40 = vector.load %arg10[%c0_25, %c0_26] : memref<8x1xf32, #tpu.memory_space<vmem>>, vector<8x1xf32>
    %41 = arith.addf %40, %31 : vector<8x1xf32>
    %c0_27 = arith.constant 0 : index
    %c0_28 = arith.constant 0 : index
    %42 = vector.load %arg10[%c0_27, %c0_28] : memref<8x1xf32, #tpu.memory_space<vmem>>, vector<8x1xf32>
    tpu.vector_store %arg10[%c0_27, %c0_28], %41 {strides = array<i32>} : memref<8x1xf32, #tpu.memory_space<vmem>>, vector<8x1xf32>,
    %c0_29 = arith.constant 0 : index
    %c0_30 = arith.constant 0 : index
    %43 = vector.load %arg7[%c0_29, %c0_30] : memref<1x1xf32, #tpu.memory_space<vmem>>, vector<1x1xf32>
    tpu.vector_store %arg7[%c0_29, %c0_30], %21 {strides = array<i32>} : memref<1x1xf32, #tpu.memory_space<vmem>>, vector<1x1xf32>,
    %c0_i32_31 = arith.constant 0 : i32
    %44 = arith.cmpi eq, %arg0, %c0_i32_31 : i32
    %45 = arith.extui %44 : i1 to i32
    %c0_i32_32 = arith.constant 0 : i32
    %46 = arith.cmpi ne, %45, %c0_i32_32 : i32
    scf.if %46 {
      %c0_33 = arith.constant 0 : index
      %c0_34 = arith.constant 0 : index
      %47 = vector.load %arg8[%c0_33, %c0_34] : memref<8x1xf32, #tpu.memory_space<vmem>>, vector<8x1xf32>
      %48 = math.log %47 : vector<8x1xf32>
      %c0_35 = arith.constant 0 : index
      %c0_36 = arith.constant 0 : index
      %49 = vector.load %arg7[%c0_35, %c0_36] : memref<1x1xf32, #tpu.memory_space<vmem>>, vector<1x1xf32>
      %50 = vector.broadcast %49 : vector<1x1xf32> to vector<8x1xf32>
      %51 = arith.addf %48, %50 : vector<8x1xf32>
      %c0_37 = arith.constant 0 : index
      %c0_38 = arith.constant 0 : index
      %52 = vector.load %arg9[%c0_37, %c0_38] : memref<8x1xf32, #tpu.memory_space<vmem>>, vector<8x1xf32>
      %c0_39 = arith.constant 0 : index
      %c0_40 = arith.constant 0 : index
      %53 = vector.load %arg10[%c0_39, %c0_40] : memref<8x1xf32, #tpu.memory_space<vmem>>, vector<8x1xf32>
      %54 = arith.divf %52, %53 : vector<8x1xf32>
      %55 = arith.subf %54, %51 : vector<8x1xf32>
      %56 = vector.shape_cast %55 : vector<8x1xf32> to vector<1x8x1xf32>
      %cst_41 = arith.constant dense<0.000000e+00> : vector<1xf32>
      %57 = vector.multi_reduction <add>, %56, %cst_41 [1, 2] : vector<1x8x1xf32> to vector<1xf32>
      %58 = vector.shape_cast %57 : vector<1xf32> to vector<1x1x1xf32>
      %59 = vector.extract %58[0, 0, 0] : f32 from vector<1x1x1xf32>
      %cst_42 = arith.constant 8.000000e+00 : f32
      %60 = arith.divf %59, %cst_42 : f32
      %cst_43 = arith.constant 0.000000e+00 : f32
      %61 = arith.subf %cst_43, %60 : f32
      %62 = vector.broadcast %61 : f32 to vector<1x1xf32>
      %c0_44 = arith.constant 0 : index
      %c0_45 = arith.constant 0 : index
      %63 = vector.load %arg5[%c0_44, %c0_45] : memref<1x1xf32, #tpu.memory_space<vmem>>, vector<1x1xf32>
      tpu.vector_store %arg5[%c0_44, %c0_45], %62 {strides = array<i32>} : memref<1x1xf32, #tpu.memory_space<vmem>>, vector<1x1xf32>,
    } else {
    }
    return
  }
  func.func @transform_0(%arg0: i32) -> (i32, i32) {
    %c0_i32 = arith.constant 0 : i32
    %c0_i32_0 = arith.constant 0 : i32
    %c0_i32_1 = arith.constant 0 : i32
    return %c0_i32, %c0_i32_0 : i32, i32
  }
  func.func @transform_1(%arg0: i32) -> (i32, i32) {
    %c0_i32 = arith.constant 0 : i32
    %c0_i32_0 = arith.constant 0 : i32
    return %arg0, %c0_i32 : i32, i32
  }
  func.func @transform_2(%arg0: i32) -> (i32, i32) {
    %c0_i32 = arith.constant 0 : i32
    %c0_i32_0 = arith.constant 0 : i32
    return %c0_i32, %arg0 : i32, i32
  }
  func.func @transform_3(%arg0: i32) -> (i32, i32) {
    %c0_i32 = arith.constant 0 : i32
    %c0_i32_0 = arith.constant 0 : i32
    return %c0_i32, %arg0 : i32, i32
  }
  func.func @transform_4(%arg0: i32) -> (i32, i32) {
    %c0_i32 = arith.constant 0 : i32
    %c0_i32_0 = arith.constant 0 : i32
    %c0_i32_1 = arith.constant 0 : i32
    return %c0_i32, %c0_i32_0 : i32, i32
  }
}

</mosaic_0001>

<bundles_post_ra>
// kernel: tpu_custom_call.1
= control target key start
LH: loop header
LB: loop body
LE: loop exit
PB: predicated region body
PF: predicated region fallthrough
CT: control target
= control target key end

     0   :  { %9 = vsyncpa [#allocation8], 0  ;;  %s497_s0 = inlined_call_operand.hbm [shape: f32[8,32], index: 0, kind: input, shape index: {}]   ;;  %s498_s1 = inlined_call_operand.hbm [shape: f32[8,32], index: 1, kind: input, shape index: {}]   ;;  %s499_s2 = inlined_call_operand.hbm [shape: f32[8,8], index: 2, kind: input, shape index: {}]   ;;  %s500_s3 = inlined_call_operand.hbm [shape: f32[8,8], index: 3, kind: input, shape index: {}]   ;;  %s501_s4 = inlined_call_operand.hbm [shape: f32[1,1], index: 4, kind: output, shape index: {}]  }
   0x1   :  { %10 = vsyncpa [#allocation11], 0 }
   0x2   :  { %11 = vsyncpa [#allocation14], 0 }
   0x3   :  { %12 = vsyncpa [#allocation9], 0  ;;  %s428_s15 = smov [#allocation10]   ;;  %s429_s17 = smov [#allocation7]  }
   0x4   :  { %s29_s16 = sshll.u32 %s428_s15, 4  ;;  %s19_s18 = sshll.u32 %s429_s17, 4  ;;  %s30_s16 = int_to_ptr.vmem [resolvable:$true] %s29_s16  ;;  %s20_s18 = int_to_ptr.vmem [resolvable:$true] %s19_s18 }
   0x5   :  { %s328_s19 = scalar_lea.vmem %s30_s16, 128  ;;  %p333_p1 = scmp.lt.s32.totalorder %s30_s16, %s30_s16 }
   0x6   :  { %p329_p0 = scmp.ne.s32.totalorder %s30_s16, %s328_s19  ;;  %p334_p2 = scmp.lt.s32.totalorder %s328_s19, %s328_s19 }
   0x8   :  { %p335_p3 = por %p334_p2, %p333_p1 }
   0xa   :  { %p336_p4 = pnand %p335_p3, %p329_p0 }
   0xc   :  { %339 = shalt.err (!%p336_p4)
}
   0xd   :  { %32 = dma.hbm_to_vmem [thread:$0]  %s498_s1, 128, %s30_s16, [#allocation11]  }
   0xe   :  { %s348_s22 = scalar_lea.vmem %s20_s18, 128  ;;  %p353_p6 = scmp.lt.s32.totalorder %s20_s18, %s20_s18 }
   0xf   :  { %p349_p5 = scmp.ne.s32.totalorder %s20_s18, %s348_s22  ;;  %p354_p7 = scmp.lt.s32.totalorder %s348_s22, %s348_s22 }
  0x11   :  { %p355_p8 = por %p354_p7, %p353_p6 }
  0x13   :  { %p356_p9 = pnand %p355_p8, %p349_p5 }
  0x15   :  { %359 = shalt.err (!%p356_p9)
}
  0x16   :  { %22 = dma.hbm_to_vmem [thread:$0]  %s497_s0, 128, %s20_s18, [#allocation8]  }
  0x17   :  { %s430_s25 = smov [#allocation12]   ;;  %s431_s27 = smov [#allocation13]  }
  0x18   :  { %s39_s26 = sshll.u32 %s430_s25, 4  ;;  %s49_s28 = sshll.u32 %s431_s27, 4  ;;  %s40_s26 = int_to_ptr.vmem [resolvable:$true] %s39_s26  ;;  %s50_s28 = int_to_ptr.vmem [resolvable:$true] %s49_s28 }
  0x19   :  { %s368_s29 = scalar_lea.vmem %s40_s26, 128  ;;  %p373_p11 = scmp.lt.s32.totalorder %s40_s26, %s40_s26 }
  0x1a   :  { %p369_p10 = scmp.ne.s32.totalorder %s40_s26, %s368_s29  ;;  %p374_p12 = scmp.lt.s32.totalorder %s368_s29, %s368_s29 }
  0x1c   :  { %p375_p13 = por %p374_p12, %p373_p11 }
  0x1e   :  { %p376_p0 = pnand %p375_p13, %p369_p10 }
  0x20   :  { %379 = shalt.err (!%p376_p0)
}
  0x21   :  { %42 = dma.hbm_to_vmem [thread:$0]  %s499_s2, 128, %s40_s26, [#allocation11]  }
  0x22   :  { %s388_s5 = scalar_lea.vmem %s50_s28, 128  ;;  %p393_p2 = scmp.lt.s32.totalorder %s50_s28, %s50_s28 }
  0x23   :  { %p389_p1 = scmp.ne.s32.totalorder %s50_s28, %s388_s5  ;;  %p394_p3 = scmp.lt.s32.totalorder %s388_s5, %s388_s5 }
  0x25   :  { %p395_p4 = por %p394_p3, %p393_p2 }
  0x27   :  { %p396_p5 = pnand %p395_p4, %p389_p1 }
  0x29   :  { %399 = shalt.err (!%p396_p5)
}
  0x2a   :  { %52 = dma.hbm_to_vmem [thread:$0]  %s500_s3, 128, %s50_s28, [#allocation14]  }
  0x2b   :  { %420 = dma.done.wait [#allocation8], 128  }
  0x2c   :  { %421 = vsyncadd [#allocation8], 4294967168 }
  0x2d   :  { %422 = dma.done.wait [#allocation11], 256  }
  0x2e   :  { %423 = vsyncadd [#allocation11], 4294967040 }
  0x2f   :  { %424 = dma.done.wait [#allocation14], 128  }
  0x30   :  { %425 = vsyncadd [#allocation14], 4294967168  ;;  %v69_v0 = vld [vmem:[#allocation7] sm:$0xff]  ;;  %vm71_vm0 = vcmask 261120   ;;  %v86_v1 = vld [vmem:[#allocation10] sm:$0xff]  ;;  %vm82_vm1 = vcmask 7168   ;;  %v192_v33 = vlaneseq }
  0x31   :  { %v70_v2 = vmul.f32 %v69_v0, %v69_v0  ;;  %v89_v3 = vmul.f32 %v86_v1, %v86_v1  ;;  %v432_v6 = vmov 0.0   ;;  %vm433_vm2 = vmmov 0   ;;  %v88_v40 = vld [vmem:[#allocation13] sm:$0xff]  ;;  %v87_v41 = vld [vmem:[#allocation12] sm:$0xff]  ;;  %s436_s7 = smov [#allocation15]  }
  0x32   :  { %83 = vst.msk [vmem:[#allocation4] sm:$0xff] %vm82_vm1, %v432_v6  ;;  %84 = vst.msk [vmem:[#allocation5] sm:$0xff] %vm82_vm1, %v432_v6  ;;  %290 = vmatprep.subr.mxu0 %v432_v6  ;;  %292 = vmatprep.mubr.msk.f32.mxu0 %vm433_vm2, %v432_v6  ;;  %vm80_vm3 = vcmask 0   ;;  %v434_v17 = vmov -inf   ;;  %vm174_vm4 = vcmask 64512   ;;  %v435_v28 = vmov 0  }
  0x33   :  { %v72_v4 = vsel %vm71_vm0, %v70_v2, 0.0  ;;  %v91_v5 = vsel %vm71_vm0, %v89_v3, 0.0  ;;  %85 = vst.msk [vmem:[#allocation6] sm:$0xff] %vm82_vm1, %v432_v6  ;;  %306 = vset.pattern.permute.xlu1 %v435_v28  ;;  %307 = vset.pattern.permute.xlu0 %v435_v28  ;;  %v193_v34 = vshrl.u32 %v192_v33, 7  ;;  %v202_v42 = vadd.f32 %v88_v40, %v87_v41  ;;  %s274_s8 = sshll.u32 %s436_s7, 4  ;;  %s275_s8 = int_to_ptr.vmem [resolvable:$true] %s274_s8 }
  0x34   :  { %73 = vadd.xlane.f32.xlu0 %v72_v4  ;;  %81 = vst.msk [vmem:[#allocation3] sm:$0x1] %vm80_vm3, %v434_v17  ;;  %v211_v46 = vsel %vm174_vm4, %v87_v41, 0.0  ;;  %s400_s10 = scalar_lea.vmem %s275_s8, 16  ;;  %s404_s11 = scalar_lea.vmem %s275_s8, 32 }
  0x35   :  { %v194_v35 = vsub.s32 0, %v193_v34  ;;  %p401_p6 = scmp.ne.s32.totalorder %s275_s8, %s400_s10  ;;  %p405_p7 = scmp.lt.s32.totalorder %s275_s8, %s275_s8 }
  0x36   :  { %p406_p8 = scmp.lt.s32.totalorder %s404_s11, %s400_s10 }
  0x38   :  { %92 = vadd.xlane.f32.xlu0 %v91_v5  ;;  %p407_p9 = por %p406_p8, %p405_p7 }
  0x39   :  { %v214_v52 = vld [vmem:[#allocation4] sm:$0xff]  ;;  %v225_v59 = vld [vmem:[#allocation5] sm:$0xff] }
  0x3a   :  { %v228_v56 = vld [vmem:[#allocation6] sm:$0xff]  ;;  %p408_p10 = pnand %p407_p9, %p401_p6 }
  0x3b   :  { %v182_v29 = vld [vmem:[#allocation3] sm:$0x1] }
  0xbd   :  { %v74_v7 = vpop.xlane.xlu0 %73 }
  0xbe   :  { %v75_v8 = vmax.f32 %v74_v7, 1e-24 }
  0xc0   :  { %308 = vrsqrt.f32 %v75_v8 }
  0xc1   :  { %v93_v9 = vpop.xlane.xlu0 %92 }
  0xc2   :  { %v94_v10 = vmax.f32 %v93_v9, 1e-24 }
  0xc4   :  { %310 = vrsqrt.f32 %v94_v10 }
  0xcd   :  { %v309_v11 = vpop.eup %308 }
  0xce   :  { %v77_v12 = vmul.f32 2.0, %v309_v11 }
  0xd0   :  { %v78_v13 = vmul.f32 %v77_v12, %v69_v0 }
  0xd1   :  { %v311_v14 = vpop.eup %310 }
  0xd2   :  { %79 = vst.msk [vmem:[#allocation2] sm:$0xff] %vm71_vm0, %v78_v13  ;;  %v96_v15 = vmul.f32 %v311_v14, %v86_v1 }
  0xd4   :  { %291 = vmatpush3.xpose.msk.msra.mxu0 %vm71_vm0, %v96_v15 }
  0xd9   :  { %v97_v16 = vld [vmem:[#allocation2] sm:$0xff] }
  0xda   :  { %293 = vmatmul.mubr.msk.f32.vlgmr.msra.gmra.mxu0 %vm71_vm0, %v97_v16 }
 0x19a   :  { %v170_v18 = vpop.f32.mrf.mxu0 }
 0x19b   :  { %v175_v19 = vsel %vm174_vm4, %v170_v18, -inf }
 0x19c   :  { %v176_v20 = vrot.slane %v175_v19, 4  ;;  %v294_v21 = vpop.f32.mrf.mxu0 }
 0x19e   :  { %v177_v22 = vmax.f32 %v175_v19, %v176_v20 }
 0x1a0   :  { %v178_v23 = vrot.slane %v177_v22, 2 }
 0x1a2   :  { %v179_v24 = vmax.f32 %v177_v22, %v178_v23 }
 0x1a4   :  { %v180_v25 = vrot.slane %v179_v24, 1 }
 0x1a6   :  { %v181_v26 = vmax.f32 %v179_v24, %v180_v25 }
 0x1a8   :  { %v183_v27 = vsel %vm174_vm4, %v181_v26, -inf  ;;  %v207_v47 = vmul.f32 %v181_v26, %v87_v41 }
 0x1a9   :  { %184 = vmax.xlane.f32.xlu1 %v183_v27 }
 0x1aa   :  { %v208_v48 = vsel %vm174_vm4, %v207_v47, 0.0 }
 0x232   :  { %v185_v30 = vpop.xlane.xlu1 %184 }
 0x233   :  { %v186_v31 = vmax.f32 %v182_v29, %v185_v30 }
 0x235   :  { %v199_v32 = vsub.f32 %v182_v29, %v186_v31  ;;  %232 = vst.msk [vmem:[#allocation3] sm:$0x1] %vm80_vm3, %v186_v31  ;;  %189 = vperm.xlu1 %306, %v186_v31  }
 0x237   :  { %v200_v49 = vmul.f32 1.442695, %v199_v32 }
 0x23c   :  { %v287_v3 = vld [vmem:[#allocation3] ss:$0 sm:$0xff] }
 0x2b0   :  { %v190_v36 = vpop.permute.xlu1 %189 }
 0x2b1   :  { %v195_v37 = vrot.slane %v190_v36, %v194_v35 }
 0x2b3   :  { %v196_v38 = vsub.f32 %v181_v26, %v195_v37 }
 0x2b5   :  { %v197_v39 = vmul.f32 1.442695, %v196_v38 }
 0x2b7   :  { %312 = vpow2.f32 %v197_v39 }
 0x2b8   :  { %314 = vpow2.f32 %v200_v49 }
 0x2c4   :  { %v313_v43 = vpop.eup %312 }
 0x2c5   :  { %v203_v44 = vmul.f32 %v313_v43, %v202_v42  ;;  %v315_v50 = vpop.eup %314 }
 0x2c6   :  { %v219_v51 = vrot.slane %v315_v50, %v194_v35 }
 0x2c7   :  { %v204_v45 = vsel %vm174_vm4, %v203_v44, 0.0 }
 0x2c8   :  { %205 = vadd.xlane.f32.xlu0 %v204_v45  ;;  %v221_v53 = vmul.f32 %v219_v51, %v214_v52 }
 0x2cc   :  { %212 = vadd.xlane.f32.xlu0 %v211_v46 }
 0x2d0   :  { %209 = vadd.xlane.f32.xlu0 %v208_v48 }
 0x351   :  { %v206_v54 = vpop.xlane.xlu0 %205 }
 0x352   :  { %v222_v55 = vadd.f32 %v221_v53, %v206_v54 }
 0x354   :  { %224 = vst.msk [vmem:[#allocation4] sm:$0xff] %vm82_vm1, %v222_v55 }
 0x355   :  { %v213_v57 = vpop.xlane.xlu0 %212 }
 0x356   :  { %v229_v58 = vadd.f32 %v228_v56, %v213_v57 }
 0x358   :  { %230 = vst.msk [vmem:[#allocation6] sm:$0xff] %vm82_vm1, %v229_v58 }
 0x359   :  { %v210_v60 = vpop.xlane.xlu0 %209 }
 0x35a   :  { %v226_v61 = vadd.f32 %v225_v59, %v210_v60 }
 0x35b   :  { %v236_v62 = vld [vmem:[#allocation4] sm:$0xff] }
 0x35c   :  { %227 = vst.msk [vmem:[#allocation5] sm:$0xff] %vm82_vm1, %v226_v61  ;;  %316 = vlog2.f32 %v236_v62 }
 0x35f   :  { %v248_v63 = vld [vmem:[#allocation6] sm:$0xff] }
 0x360   :  { %318 = vrcp.f32 %v248_v63 }
 0x363   :  { %v247_v4 = vld [vmem:[#allocation5] sm:$0xff] }
 0x369   :  { %v317_v0 = vpop.eup %316 }
 0x36a   :  { %v238_v1 = vmul.f32 0.6931472, %v317_v0 }
 0x36c   :  { %v246_v5 = vadd.f32 %v287_v3, %v238_v1 }
 0x36d   :  { %v319_v2 = vpop.eup %318 }
 0x36e   :  { %v250_v6 = vmul.f32 %v319_v2, %v247_v4 }
 0x370   :  { %v251_v7 = vsub.f32 %v250_v6, %v246_v5 }
 0x372   :  { %v252_v8 = vsel %vm82_vm1, %v251_v7, 0.0 }
 0x373   :  { %253 = vadd.xlane.f32.xlu0 %v252_v8 }
 0x3fc   :  { %v254_v9 = vpop.xlane.xlu0 %253 }
 0x3fd   :  { %v255_v10 = vrot.slane %v254_v9, 4 }
 0x3ff   :  { %v256_v11 = vadd.f32 %v255_v10, %v254_v9 }
 0x401   :  { %v257_v12 = vrot.slane %v256_v11, 2 }
 0x403   :  { %v258_v13 = vadd.f32 %v257_v12, %v256_v11 }
 0x405   :  { %v259_v14 = vrot.slane %v258_v13, 1 }
 0x407   :  { %v260_v15 = vadd.f32 %v259_v14, %v258_v13 }
 0x409   :  { %295 = vpush %v260_v15 }
 0x43a   :  { %s296_s2 = spop %295 }
 0x43b   :  { %s264_s3 = smul.f32 0.125, %s296_s2 }
 0x43d   :  { %s265_s9 = ssub.f32 0.0, %s264_s3 }
 0x43f   :  { %v266_v16 = vstv %s265_s9 }
 0x440   :  { %267 = vst.msk [vmem:[#allocation15] sm:$0x1] %vm80_vm3, %v266_v16 }
 0x441   :  { %411 = shalt.err (!%p408_p10)
}
 0x442   :  { %277 = dma.vmem_to_hbm [thread:$0]  %s275_s8, 16, %s501_s4, [#allocation9]  }
 0x443   :  { %426 = dma.done.wait [#allocation9], 16  }
 0x444   :  { %427 = vsyncadd [#allocation9], 4294967280 }
 0x445   :  { %281 = vsyncpa [#allocation8], 1 }
 0x446   :  { %282 = vsyncpa [#allocation11], 1 }
 0x447   :  { %283 = vsyncpa [#allocation14], 1 }
 0x448   :  { %284 = vsyncpa [#allocation9], 1 }

</bundles_post_ra>
